<compile_context>
chip_gen: v5e
topology: v5e:2x2
jax: 0.10.0
libtpu: 0.0.40
codegen_flags: <defaults>
</compile_context>

<pallas_src>
import jax
import jax.numpy as jnp
from jax.experimental import pallas as pl
from jax.experimental.pallas import tpu as pltpu

N       = 128                 # num_nodes
DIM_IN  = 32                  # cfg.share.dim_in
DIM_PE  = 32                  # cfg.posenc_Node2VecLearnable.dim_pe
DIM_EMB = 64                  # dim_emb
DIM_H   = DIM_EMB - DIM_PE    # output width of linear_x


def encoder_kernel(xe_ref, w_ref, p_ref, out_ref):
    # xe: (N, DIM_IN + DIM_PE) = [x | emb]
    # w : (DIM_IN + DIM_PE, DIM_EMB) block-diagonal [[wx, 0], [0, wenc]]
    # p : (3, DIM_EMB) rows = [bx|benc], [1..1|gamma], [0..0|beta]
    xe = xe_ref[...].astype(jnp.float32)

    # Column mask for the emb columns of the packed input (lane-aligned
    # selects only, no cross-lane data movement).
    in_col = jax.lax.broadcasted_iota(jnp.int32, (1, DIM_IN + DIM_PE), 1)
    is_emb_in = in_col >= DIM_IN

    # ---- F.normalize over the emb columns: v * rsqrt(max(sum(v^2), 1e-24))
    # (identical to v / max(||v||, 1e-12)); single EUP rsqrt instead of
    # sqrt + divide.
    sq = jnp.where(is_emb_in, xe * xe, 0.0)
    ss = jnp.sum(sq, axis=-1, keepdims=True)                     # (N, 1)
    inv_norm = jax.lax.rsqrt(jnp.maximum(ss, 1e-24))
    operand = jnp.where(is_emb_in, xe * inv_norm, xe)            # [x | pe_n]

    # ---- Fused block-diagonal matmul + packed bias:
    #   [x | pe_n] @ [[wx, 0], [0, wenc]] + [bx | benc]
    #   -> columns 0:DIM_H are h, columns DIM_H: are encoder(pe_n).
    p = p_ref[...]
    bias, gamma, beta = p[0:1, :], p[1:2, :], p[2:3, :]
    y = jnp.dot(operand, w_ref[...],
                preferred_element_type=jnp.float32) + bias       # (N, DIM_EMB)

    # ---- BatchNorm1d (training-mode batch stats, biased variance) applied
    # only to the pe output columns, expressed as a per-column scale/shift
    # that is the identity on the h columns -> one lane-dense store.
    mean = jnp.mean(y, axis=0, keepdims=True)
    var = jnp.mean((y - mean) ** 2, axis=0, keepdims=True)
    inv_std = jax.lax.rsqrt(var + 1e-5)
    out_col = jax.lax.broadcasted_iota(jnp.int32, (1, DIM_EMB), 1)
    is_pe_out = out_col >= DIM_H
    scale = jnp.where(is_pe_out, gamma * inv_std, 1.0)
    shift = jnp.where(is_pe_out, beta - mean * gamma * inv_std, 0.0)
    out_ref[...] = y * scale + shift


def node2vec_learnable_encoder(x, emb, wx, bx, wenc, benc, gamma, beta):
    # Host-side packing (layout plumbing only):
    #   xe        = [x | emb]                           (N, 64)
    #   w_packed  = block-diag(wx, wenc)                (64, 64)
    #   params    = [[bx|benc], [1|gamma], [0|beta]]    (3, 64)
    n = x.shape[0]
    xe = jnp.concatenate([x.astype(jnp.float32), emb.astype(jnp.float32)],
                         axis=1)
    w_packed = jnp.zeros((DIM_IN + DIM_PE, DIM_EMB), jnp.float32)
    w_packed = w_packed.at[:DIM_IN, :DIM_H].set(wx)
    w_packed = w_packed.at[DIM_IN:, DIM_H:].set(wenc)
    params = jnp.concatenate(
        [jnp.concatenate([bx, benc], axis=1),
         jnp.concatenate([jnp.ones((1, DIM_H), jnp.float32), gamma], axis=1),
         jnp.concatenate([jnp.zeros((1, DIM_H), jnp.float32), beta], axis=1)],
        axis=0)

    return pl.pallas_call(
        encoder_kernel,
        out_shape=jax.ShapeDtypeStruct((n, DIM_EMB), jnp.float32),
        in_specs=[pl.BlockSpec(memory_space=pltpu.MemorySpace.VMEM)] * 3,
        out_specs=pl.BlockSpec(memory_space=pltpu.MemorySpace.VMEM),
    )(xe, w_packed, params)


def reference(x, emb, wx, bx, wenc, benc, gamma, beta):
    h = x.astype(jnp.float32) @ wx + bx
    pe = emb.astype(jnp.float32)
    pe = pe / jnp.maximum(jnp.linalg.norm(pe, axis=-1, keepdims=True), 1e-12)
    pe = pe @ wenc + benc
    mean = jnp.mean(pe, axis=0, keepdims=True)
    var = jnp.mean((pe - mean) ** 2, axis=0, keepdims=True)
    pe = (pe - mean) / jnp.sqrt(var + 1e-5) * gamma + beta
    return jnp.concatenate([h, pe], axis=1)


if __name__ == "__main__":
    key = jax.random.PRNGKey(0)
    kx, kemb, kwx, kbx, kwe, kbe = jax.random.split(key, 6)

    # deterministic synthetic inputs / parameters
    x    = jax.random.normal(kx,   (N, DIM_IN),  dtype=jnp.float32)  # batch.x
    emb  = jax.random.normal(kemb, (N, DIM_PE),  dtype=jnp.float32)  # Node2Vec table
    wx   = jax.random.normal(kwx,  (DIM_IN, DIM_H),
                             dtype=jnp.float32) * (1.0 / jnp.sqrt(DIM_IN))
    bx   = jax.random.normal(kbx,  (1, DIM_H),   dtype=jnp.float32) * 0.01
    wenc = jax.random.normal(kwe,  (DIM_PE, DIM_PE),
                             dtype=jnp.float32) * (1.0 / jnp.sqrt(DIM_PE))
    benc = jax.random.normal(kbe,  (1, DIM_PE),  dtype=jnp.float32) * 0.01
    gamma = jnp.ones((1, DIM_PE), dtype=jnp.float32)   # BatchNorm1d affine init
    beta  = jnp.zeros((1, DIM_PE), dtype=jnp.float32)

    out = node2vec_learnable_encoder(x, emb, wx, bx, wenc, benc, gamma, beta)
    out = jax.block_until_ready(out)

    ref = reference(x, emb, wx, bx, wenc, benc, gamma, beta)
    assert out.shape == (N, DIM_EMB)
    assert jnp.allclose(out, ref, atol=1e-4, rtol=1e-4)

    print("KERNEL_OK")
</pallas_src>

<mosaic_0001>
module attributes {stable_mosaic.version = 11 : i64} {
  func.func @encoder_kernel(%arg0: memref<128x64xf32, #tpu.memory_space<vmem>>, %arg1: memref<64x64xf32, #tpu.memory_space<vmem>>, %arg2: memref<3x64xf32, #tpu.memory_space<vmem>>, %arg3: memref<128x64xf32, #tpu.memory_space<vmem>>) attributes {dimension_semantics = [], scalar_prefetch = 0 : i64, scratch_operands = 0 : i64, tpu.core_type = #tpu.core_type<tc>} {
    %c0 = arith.constant 0 : index
    %c0_0 = arith.constant 0 : index
    %0 = vector.load %arg0[%c0, %c0_0] : memref<128x64xf32, #tpu.memory_space<vmem>>, vector<128x64xf32>
    %1 = tpu.iota {dimensions = array<i32: 1>} : vector<1x64xi32>
    %c32_i32 = arith.constant 32 : i32
    %2 = vector.broadcast %c32_i32 : i32 to vector<1x64xi32>
    %3 = arith.cmpi sge, %1, %2 : vector<1x64xi32>
    %4 = arith.mulf %0, %0 : vector<128x64xf32>
    %cst = arith.constant 0.000000e+00 : f32
    %5 = vector.shape_cast %3 : vector<1x64xi1> to vector<1x64xi1>
    %6 = vector.broadcast %5 : vector<1x64xi1> to vector<128x64xi1>
    %7 = vector.broadcast %cst : f32 to vector<128x64xf32>
    %8 = arith.select %6, %4, %7 : vector<128x64xi1>, vector<128x64xf32>
    %cst_1 = arith.constant dense<0.000000e+00> : vector<128xf32>
    %9 = vector.multi_reduction <add>, %8, %cst_1 [1] : vector<128x64xf32> to vector<128xf32>
    %10 = vector.shape_cast %9 : vector<128xf32> to vector<128x1xf32>
    %cst_2 = arith.constant 1.000000e-24 : f32
    %11 = vector.broadcast %cst_2 : f32 to vector<128x1xf32>
    %12 = arith.maximumf %10, %11 : vector<128x1xf32>
    %13 = math.rsqrt %12 : vector<128x1xf32>
    %14 = vector.broadcast %13 : vector<128x1xf32> to vector<128x64xf32>
    %15 = arith.mulf %0, %14 : vector<128x64xf32>
    %16 = vector.shape_cast %3 : vector<1x64xi1> to vector<1x64xi1>
    %17 = vector.broadcast %16 : vector<1x64xi1> to vector<128x64xi1>
    %18 = arith.select %17, %15, %0 : vector<128x64xi1>, vector<128x64xf32>
    %c0_3 = arith.constant 0 : index
    %c0_4 = arith.constant 0 : index
    %19 = vector.load %arg2[%c0_3, %c0_4] : memref<3x64xf32, #tpu.memory_space<vmem>>, vector<3x64xf32>
    %20 = vector.extract_strided_slice %19 {offsets = [0, 0], sizes = [1, 64], strides = [1, 1]} : vector<3x64xf32> to vector<1x64xf32>
    %21 = vector.extract_strided_slice %19 {offsets = [1, 0], sizes = [1, 64], strides = [1, 1]} : vector<3x64xf32> to vector<1x64xf32>
    %22 = vector.extract_strided_slice %19 {offsets = [2, 0], sizes = [1, 64], strides = [1, 1]} : vector<3x64xf32> to vector<1x64xf32>
    %c0_5 = arith.constant 0 : index
    %c0_6 = arith.constant 0 : index
    %23 = vector.load %arg1[%c0_5, %c0_6] : memref<64x64xf32, #tpu.memory_space<vmem>>, vector<64x64xf32>
    %cst_7 = arith.constant dense<0.000000e+00> : vector<128x64xf32>
    %24 = tpu.matmul %18, %23, %cst_7 {dimension_numbers = #tpu.dot_dimension_numbers<[1], [0], [0], [1], [0, 0, 1, 1], [], []>} : vector<128x64xf32>, vector<64x64xf32>, vector<128x64xf32> -> vector<128x64xf32>
    %25 = vector.broadcast %20 : vector<1x64xf32> to vector<128x64xf32>
    %26 = arith.addf %24, %25 : vector<128x64xf32>
    %cst_8 = arith.constant dense<0.000000e+00> : vector<64xf32>
    %27 = vector.multi_reduction <add>, %26, %cst_8 [0] : vector<128x64xf32> to vector<64xf32>
    %28 = vector.shape_cast %27 : vector<64xf32> to vector<1x64xf32>
    %cst_9 = arith.constant 1.280000e+02 : f32
    %29 = vector.broadcast %cst_9 : f32 to vector<1x64xf32>
    %30 = arith.divf %28, %29 : vector<1x64xf32>
    %31 = vector.broadcast %30 : vector<1x64xf32> to vector<128x64xf32>
    %32 = arith.subf %26, %31 : vector<128x64xf32>
    %33 = arith.mulf %32, %32 : vector<128x64xf32>
    %cst_10 = arith.constant dense<0.000000e+00> : vector<64xf32>
    %34 = vector.multi_reduction <add>, %33, %cst_10 [0] : vector<128x64xf32> to vector<64xf32>
    %35 = vector.shape_cast %34 : vector<64xf32> to vector<1x64xf32>
    %cst_11 = arith.constant 1.280000e+02 : f32
    %36 = vector.broadcast %cst_11 : f32 to vector<1x64xf32>
    %37 = arith.divf %35, %36 : vector<1x64xf32>
    %cst_12 = arith.constant 9.99999974E-6 : f32
    %38 = vector.broadcast %cst_12 : f32 to vector<1x64xf32>
    %39 = arith.addf %37, %38 : vector<1x64xf32>
    %40 = math.rsqrt %39 : vector<1x64xf32>
    %41 = tpu.iota {dimensions = array<i32: 1>} : vector<1x64xi32>
    %c32_i32_13 = arith.constant 32 : i32
    %42 = vector.broadcast %c32_i32_13 : i32 to vector<1x64xi32>
    %43 = arith.cmpi sge, %41, %42 : vector<1x64xi32>
    %44 = arith.mulf %21, %40 : vector<1x64xf32>
    %cst_14 = arith.constant 1.000000e+00 : f32
    %45 = vector.broadcast %cst_14 : f32 to vector<1x64xf32>
    %46 = arith.select %43, %44, %45 : vector<1x64xi1>, vector<1x64xf32>
    %47 = arith.mulf %30, %21 : vector<1x64xf32>
    %48 = arith.mulf %47, %40 : vector<1x64xf32>
    %49 = arith.subf %22, %48 : vector<1x64xf32>
    %cst_15 = arith.constant 0.000000e+00 : f32
    %50 = vector.broadcast %cst_15 : f32 to vector<1x64xf32>
    %51 = arith.select %43, %49, %50 : vector<1x64xi1>, vector<1x64xf32>
    %52 = vector.broadcast %46 : vector<1x64xf32> to vector<128x64xf32>
    %53 = arith.mulf %26, %52 : vector<128x64xf32>
    %54 = vector.broadcast %51 : vector<1x64xf32> to vector<128x64xf32>
    %55 = arith.addf %53, %54 : vector<128x64xf32>
    %c0_16 = arith.constant 0 : index
    %c0_17 = arith.constant 0 : index
    %56 = vector.load %arg3[%c0_16, %c0_17] : memref<128x64xf32, #tpu.memory_space<vmem>>, vector<128x64xf32>
    tpu.vector_store %arg3[%c0_16, %c0_17], %55 {strides = array<i32>} : memref<128x64xf32, #tpu.memory_space<vmem>>, vector<128x64xf32>,
    return
  }
}

</mosaic_0001>

<bundles_post_ra>
// kernel: tpu_custom_call.1
= control target key start
LH: loop header
LB: loop body
LE: loop exit
PB: predicated region body
PF: predicated region fallthrough
CT: control target
= control target key end

     0   :  { %v30_v0 = vlaneseq  ;;  %vm67_vm0 = vcmask 523264   ;;  %s1482_s0 = inlined_call_operand.vmem [shape: f32[128,64], index: 0, kind: input, shape index: {}]   ;;  %s1483_s1 = inlined_call_operand.vmem [shape: f32[64,64], index: 1, kind: input, shape index: {}]   ;;  %s1484_s2 = inlined_call_operand.vmem [shape: f32[3,64], index: 2, kind: input, shape index: {}]   ;;  %s1485_s3 = inlined_call_operand.vmem [shape: f32[128,64], index: 3, kind: output, shape index: {}]  }
   0x1   :  { %v737_v1 = vld [vmem:[%s1482_s0 + $0x20] sm:$0xff]  ;;  %v742_v2 = vld [vmem:[%s1482_s0 + $0x10] sm:$0xff]  ;;  %v765_v9 = vld [vmem:[%s1482_s0 + $0x28] sm:$0xff] }
   0x2   :  { %v747_v3 = vld [vmem:[%s1482_s0] sm:$0xff]  ;;  %v749_v4 = vand.u32 127, %v30_v0  ;;  %v37_v5 = vmul.f32 %v737_v1, %v737_v1  ;;  %v35_v6 = vmul.f32 %v742_v2, %v742_v2  ;;  %v770_v10 = vld [vmem:[%s1482_s0 + $0x8] sm:$0xff]  ;;  %v38_v15 = vmul.f32 %v765_v9, %v765_v9  ;;  %v802_v24 = vld [vmem:[%s1482_s0 + $0x18] sm:$0xff] }
   0x3   :  { %v33_v7 = vmul.f32 %v747_v3, %v747_v3  ;;  %v760_v8 = vld [vmem:[%s1482_s0 + $0x40] sm:$0xff]  ;;  %v34_v19 = vmul.f32 %v770_v10, %v770_v10  ;;  %v807_v25 = vld [vmem:[%s1482_s0 + $0x48] sm:$0xff]  ;;  %v36_v30 = vmul.f32 %v802_v24, %v802_v24  ;;  %v827_v35 = vld [vmem:[%s1482_s0 + $0x50] sm:$0xff] }
   0x4   :  { %vm32_vm1 = vcmp.ge.s32.totalorder %v749_v4, 32  ;;  %v41_v11 = vmul.f32 %v760_v8, %v760_v8  ;;  %v797_v23 = vld [vmem:[%s1482_s0 + $0x60] sm:$0xff]  ;;  %v42_v31 = vmul.f32 %v807_v25, %v807_v25  ;;  %v832_v36 = vld [vmem:[%s1482_s0 + $0x68] sm:$0xff]  ;;  %v837_v37 = vld [vmem:[%s1482_s0 + $0x30] sm:$0xff]  ;;  %v43_v41 = vmul.f32 %v827_v35, %v827_v35 }
   0x5   :  { %v55_v12 = vsel %vm32_vm1, %v37_v5, 0.0  ;;  %v53_v13 = vsel %vm32_vm1, %v35_v6, 0.0  ;;  %v51_v14 = vsel %vm32_vm1, %v33_v7, 0.0  ;;  %v56_v21 = vsel %vm32_vm1, %v38_v15, 0.0  ;;  %v857_v47 = vld [vmem:[%s1482_s0 + $0x58] sm:$0xff]  ;;  %v862_v48 = vld [vmem:[%s1482_s0 + $0x70] sm:$0xff] }
   0x6   :  { %v80_v16 = vsel %vm67_vm0, %v55_v12, 0.0  ;;  %v74_v17 = vsel %vm67_vm0, %v53_v13, 0.0  ;;  %v68_v18 = vsel %vm67_vm0, %v51_v14, 0.0  ;;  %v59_v20 = vsel %vm32_vm1, %v41_v11, 0.0  ;;  %v867_v49 = vld [vmem:[%s1482_s0 + $0x38] sm:$0xff]  ;;  %v331_v7 = vld [vmem:[%s1483_s1 + $0x30] sm:$0xff] }
   0x7   :  { %81 = vadd.xlane.f32.xlu1 %v80_v16  ;;  %75 = vadd.xlane.f32.xlu2 %v74_v17  ;;  %v52_v22 = vsel %vm32_vm1, %v34_v19, 0.0  ;;  %v92_v26 = vsel %vm67_vm0, %v59_v20, 0.0  ;;  %v83_v27 = vsel %vm67_vm0, %v56_v21, 0.0  ;;  %v45_v29 = vmul.f32 %v797_v23, %v797_v23  ;;  %v887_v59 = vld [vmem:[%s1482_s0 + $0x78] sm:$0xff]  ;;  %v330_v11 = vld [vmem:[%s1483_s1 + $0x28] sm:$0xff]  ;;  %v329_v12 = vld [vmem:[%s1483_s1 + $0x20] sm:$0xff] }
   0x8   :  { %69 = vadd.xlane.f32.xlu0 %v68_v18  ;;  %v71_v28 = vsel %vm67_vm0, %v52_v22, 0.0  ;;  %v54_v33 = vsel %vm32_vm1, %v36_v30, 0.0  ;;  %v60_v34 = vsel %vm32_vm1, %v42_v31, 0.0  ;;  %v46_v42 = vmul.f32 %v832_v36, %v832_v36  ;;  %v332_v6 = vld [vmem:[%s1483_s1 + $0x38] sm:$0xff]  ;;  %v327_v14 = vld [vmem:[%s1483_s1 + $0x10] sm:$0xff]  ;;  %v326_v15 = vld [vmem:[%s1483_s1 + $0x8] sm:$0xff] }
   0x9   :  { %v63_v32 = vsel %vm32_vm1, %v45_v29, 0.0  ;;  %v77_v39 = vsel %vm67_vm0, %v54_v33, 0.0  ;;  %v95_v40 = vsel %vm67_vm0, %v60_v34, 0.0  ;;  %v39_v43 = vmul.f32 %v837_v37, %v837_v37  ;;  %390 = vmatpush.msra.mxu0 %v332_v6  ;;  %652 = vmatpush.msra.mxu1 %v332_v6  ;;  %v328_v13 = vld [vmem:[%s1483_s1 + $0x18] sm:$0xff]  ;;  %v325_v16 = vld [vmem:[%s1483_s1] sm:$0xff] }
   0xa   :  { %v104_v38 = vsel %vm67_vm0, %v63_v32, 0.0  ;;  %v61_v44 = vsel %vm32_vm1, %v43_v41, 0.0  ;;  %v64_v45 = vsel %vm32_vm1, %v46_v42, 0.0  ;;  %v44_v53 = vmul.f32 %v857_v47, %v857_v47  ;;  %653 = vmatpush.msra.mxu2 %v332_v6  ;;  %654 = vmatpush.msra.mxu3 %v332_v6 }
   0xb   :  { %v57_v46 = vsel %vm32_vm1, %v39_v43, 0.0  ;;  %v98_v50 = vsel %vm67_vm0, %v61_v44, 0.0  ;;  %v107_v51 = vsel %vm67_vm0, %v64_v45, 0.0  ;;  %v47_v54 = vmul.f32 %v862_v48, %v862_v48  ;;  %391 = vmatpush.msra.mxu0 %v331_v7  ;;  %655 = vmatpush.msra.mxu1 %v331_v7 }
   0xc   :  { %v86_v52 = vsel %vm67_vm0, %v57_v46, 0.0  ;;  %v40_v55 = vmul.f32 %v867_v49, %v867_v49  ;;  %v62_v56 = vsel %vm32_vm1, %v44_v53, 0.0  ;;  %v48_v63 = vmul.f32 %v887_v59, %v887_v59  ;;  %656 = vmatpush.msra.mxu2 %v331_v7  ;;  %657 = vmatpush.msra.mxu3 %v331_v7 }
   0xd   :  { %v65_v57 = vsel %vm32_vm1, %v47_v54, 0.0  ;;  %v101_v60 = vsel %vm67_vm0, %v62_v56, 0.0  ;;  %392 = vmatpush.msra.mxu0 %v330_v11  ;;  %658 = vmatpush.msra.mxu1 %v330_v11 }
   0xe   :  { %v58_v58 = vsel %vm32_vm1, %v40_v55, 0.0  ;;  %v110_v61 = vsel %vm67_vm0, %v65_v57, 0.0  ;;  %v66_v0 = vsel %vm32_vm1, %v48_v63, 0.0  ;;  %659 = vmatpush.msra.mxu2 %v330_v11  ;;  %660 = vmatpush.msra.mxu3 %v330_v11 }
   0xf   :  { %93 = vadd.xlane.f32.xlu1 %v92_v26  ;;  %84 = vadd.xlane.f32.xlu2 %v83_v27  ;;  %v89_v62 = vsel %vm67_vm0, %v58_v58, 0.0  ;;  %v113_v5 = vsel %vm67_vm0, %v66_v0, 0.0 }
  0x10   :  { %72 = vadd.xlane.f32.xlu0 %v71_v28  ;;  %393 = vmatpush.msra.mxu0 %v329_v12 }
  0x11   :  { %661 = vmatpush.msra.mxu1 %v329_v12  ;;  %662 = vmatpush.msra.mxu2 %v329_v12 }
  0x12   :  { %663 = vmatpush.msra.mxu3 %v329_v12  ;;  %394 = vmatpush.msra.mxu0 %v328_v13 }
  0x13   :  { %664 = vmatpush.msra.mxu1 %v328_v13  ;;  %665 = vmatpush.msra.mxu2 %v328_v13 }
  0x14   :  { %666 = vmatpush.msra.mxu3 %v328_v13  ;;  %395 = vmatpush.msra.mxu0 %v327_v14 }
  0x15   :  { %667 = vmatpush.msra.mxu1 %v327_v14  ;;  %668 = vmatpush.msra.mxu2 %v327_v14 }
  0x16   :  { %669 = vmatpush.msra.mxu3 %v327_v14  ;;  %396 = vmatpush.msra.mxu0 %v326_v15 }
  0x17   :  { %105 = vadd.xlane.f32.xlu1 %v104_v38  ;;  %78 = vadd.xlane.f32.xlu2 %v77_v39 }
  0x18   :  { %96 = vadd.xlane.f32.xlu0 %v95_v40  ;;  %670 = vmatpush.msra.mxu1 %v326_v15 }
  0x19   :  { %671 = vmatpush.msra.mxu2 %v326_v15  ;;  %672 = vmatpush.msra.mxu3 %v326_v15 }
  0x1a   :  { %397 = vmatpush.msra.mxu0 %v325_v16  ;;  %673 = vmatpush.msra.mxu1 %v325_v16 }
  0x1b   :  { %674 = vmatpush.msra.mxu2 %v325_v16  ;;  %675 = vmatpush.msra.mxu3 %v325_v16 }
  0x1f   :  { %99 = vadd.xlane.f32.xlu1 %v98_v50  ;;  %108 = vadd.xlane.f32.xlu2 %v107_v51 }
  0x20   :  { %87 = vadd.xlane.f32.xlu0 %v86_v52 }
  0x27   :  { %102 = vadd.xlane.f32.xlu1 %v101_v60  ;;  %111 = vadd.xlane.f32.xlu2 %v110_v61 }
  0x28   :  { %90 = vadd.xlane.f32.xlu0 %v89_v62 }
  0x30   :  { %114 = vadd.xlane.f32.xlu0 %v113_v5 }
  0x7a   :  { %v82_v17 = vpop.xlane.xlu1 %81  ;;  %v76_v18 = vpop.xlane.xlu2 %75 }
  0x7b   :  { %v120_v19 = vmax.f32 %v82_v17, 1e-24  ;;  %v921_v20 = vmax.f32 %v76_v18, 1e-24  ;;  %v70_v21 = vpop.xlane.xlu0 %69 }
  0x7c   :  { %v923_v22 = vmax.f32 %v70_v21, 1e-24 }
  0x7d   :  { %677 = vrsqrt.f32 %v120_v19  ;;  %vm178_vm3 = vweird.f32 %v120_v19  ;;  %vm158_vm9 = vweird.f32 %v921_v20 }
  0x7e   :  { %679 = vrsqrt.f32 %v921_v20  ;;  %vm138_vm4 = vweird.f32 %v923_v22 }
  0x7f   :  { %681 = vrsqrt.f32 %v923_v22 }
  0x82   :  { %v94_v26 = vpop.xlane.xlu1 %93  ;;  %v85_v27 = vpop.xlane.xlu2 %84 }
  0x83   :  { %v678_v28 = vpop.eup %677  ;;  %v927_v29 = vmax.f32 %v94_v26, 1e-24  ;;  %v929_v30 = vmax.f32 %v85_v27, 1e-24  ;;  %v73_v31 = vpop.xlane.xlu0 %72 }
  0x84   :  { %v931_v32 = vpop.eup %679  ;;  %v173_v33 = vmul.f32 %v678_v28, %v120_v19  ;;  %v933_v34 = vmax.f32 %v73_v31, 1e-24  ;;  %vm179_vm2 = vweird.f32 %v678_v28 }
  0x85   :  { %v935_v38 = vpop.eup %681  ;;  %v153_v39 = vmul.f32 %v931_v32, %v921_v20  ;;  %683 = vrsqrt.f32 %v927_v29  ;;  %vm180_vm5 = vmor %vm178_vm3, %vm179_vm2  ;;  %vm159_vm7 = vweird.f32 %v931_v32  ;;  %vm218_vm8 = vweird.f32 %v927_v29 }
  0x86   :  { %v174_v40 = vmul.f32 %v678_v28, %v173_v33  ;;  %v133_v41 = vmul.f32 %v935_v38, %v923_v22  ;;  %685 = vrsqrt.f32 %v929_v30  ;;  %vm139_vm6 = vweird.f32 %v935_v38 }
  0x87   :  { %687 = vrsqrt.f32 %v933_v34  ;;  %v154_v44 = vmul.f32 %v931_v32, %v153_v39  ;;  %vm984_vm11 = vmor %vm138_vm4, %vm139_vm6  ;;  %vm188_vm13 = vweird.f32 %v929_v30  ;;  %vm148_vm14 = vweird.f32 %v933_v34 }
  0x88   :  { %v175_v42 = vmul.f32 0.5, %v174_v40  ;;  %v134_v43 = vmul.f32 %v935_v38, %v133_v41  ;;  %vm1053_vm4 = vmor %vm158_vm9, %vm159_vm7 }
  0x89   :  { %v155_v62 = vmul.f32 0.5, %v154_v44 }
  0x8a   :  { %v176_v45 = vsub.f32 1.5, %v175_v42  ;;  %v135_v46 = vmul.f32 0.5, %v134_v43  ;;  %v106_v50 = vpop.xlane.xlu1 %105  ;;  %v79_v51 = vpop.xlane.xlu2 %78 }
  0x8b   :  { %v946_v52 = vpop.eup %683  ;;  %v948_v53 = vmax.f32 %v106_v50, 1e-24  ;;  %v950_v54 = vmax.f32 %v79_v51, 1e-24  ;;  %v97_v55 = vpop.xlane.xlu0 %96  ;;  %v156_v15 = vsub.f32 1.5, %v155_v62 }
  0x8c   :  { %v952_v56 = vpop.eup %685  ;;  %v177_v57 = vmul.f32 %v678_v28, %v176_v45  ;;  %v136_v58 = vsub.f32 1.5, %v135_v46  ;;  %v213_v60 = vmul.f32 %v946_v52, %v927_v29  ;;  %v971_v13 = vmax.f32 %v97_v55, 1e-24 }
  0x8d   :  { %v956_v61 = vpop.eup %687  ;;  %v183_v63 = vmul.f32 %v952_v56, %v929_v30  ;;  %689 = vrsqrt.f32 %v948_v53  ;;  %vm219_vm10 = vweird.f32 %v946_v52  ;;  %vm189_vm12 = vweird.f32 %v952_v56 }
  0x8e   :  { %v214_v0 = vmul.f32 %v946_v52, %v213_v60  ;;  %v143_v5 = vmul.f32 %v956_v61, %v933_v34  ;;  %v137_v6 = vmul.f32 %v935_v38, %v136_v58  ;;  %691 = vrsqrt.f32 %v950_v54  ;;  %vm220_vm15 = vmor %vm218_vm8, %vm219_vm10 }
  0x8f   :  { %v184_v7 = vmul.f32 %v952_v56, %v183_v63  ;;  %v181_v14 = vsel %vm180_vm5, %v678_v28, %v177_v57  ;;  %693 = vrsqrt.f32 %v971_v13  ;;  %v1010_v45 = vmul.f32 %v931_v32, %v156_v15  ;;  %vm1019_vm2 = vmor %vm188_vm13, %vm189_vm12 }
  0x90   :  { %v215_v11 = vmul.f32 0.5, %v214_v0  ;;  %v144_v12 = vmul.f32 %v956_v61, %v143_v5  ;;  %v296_v17 = vmul.f32 %v181_v14, %v737_v1  ;;  %v141_v43 = vsel %vm984_vm11, %v935_v38, %v137_v6 }
  0x91   :  { %v185_v16 = vmul.f32 0.5, %v184_v7  ;;  %v292_v51 = vmul.f32 %v141_v43, %v747_v3  ;;  %vm149_vm3 = vweird.f32 %v956_v61  ;;  %vm258_vm5 = vweird.f32 %v948_v53 }
  0x92   :  { %v216_v18 = vsub.f32 1.5, %v215_v11  ;;  %v145_v19 = vmul.f32 0.5, %v144_v12  ;;  %v100_v21 = vpop.xlane.xlu1 %99  ;;  %v109_v26 = vpop.xlane.xlu2 %108  ;;  %v312_v33 = vsel %vm32_vm1, %v296_v17, %v737_v1  ;;  %vm228_vm6 = vweird.f32 %v971_v13  ;;  %vm1083_vm8 = vmor %vm148_vm14, %vm149_vm3 }
  0x93   :  { %v978_v27 = vpop.eup %689  ;;  %v186_v31 = vsub.f32 1.5, %v185_v16  ;;  %v991_v39 = vmax.f32 %v100_v21, 1e-24  ;;  %v993_v40 = vmax.f32 %v109_v26, 1e-24  ;;  %v88_v41 = vpop.xlane.xlu0 %87  ;;  %640 = vmatmul.msk.f32.vlgmr.msra.gmra.mxu1 %vm67_vm0, %v312_v33  ;;  %vm168_vm12 = vweird.f32 %v950_v54 }
  0x94   :  { %v217_v42 = vmul.f32 %v946_v52, %v216_v18  ;;  %v253_v22 = vmul.f32 %v978_v27, %v948_v53  ;;  %v1003_v44 = vpop.eup %691  ;;  %v146_v46 = vsub.f32 1.5, %v145_v19  ;;  %v1025_v55 = vmax.f32 %v88_v41, 1e-24 }
  0x95   :  { %v187_v1 = vmul.f32 %v952_v56, %v186_v31  ;;  %695 = vrsqrt.f32 %v991_v39  ;;  %v163_v50 = vmul.f32 %v1003_v44, %v950_v54  ;;  %v1028_v29 = vpop.eup %693  ;;  %v161_v19 = vsel %vm1053_vm4, %v931_v32, %v1010_v45 }
  0x96   :  { %v254_v38 = vmul.f32 %v978_v27, %v253_v22  ;;  %697 = vrsqrt.f32 %v993_v40  ;;  %v221_v57 = vsel %vm220_vm15, %v946_v52, %v217_v42  ;;  %v223_v0 = vmul.f32 %v1028_v29, %v971_v13 }
  0x97   :  { %v164_v60 = vmul.f32 %v1003_v44, %v163_v50  ;;  %v300_v62 = vmul.f32 %v221_v57, %v760_v8  ;;  %v191_v63 = vsel %vm1019_vm2, %v952_v56, %v187_v1  ;;  %v308_v52 = vsel %vm32_vm1, %v292_v51, %v747_v3 }
  0x98   :  { %v255_v58 = vmul.f32 0.5, %v254_v38  ;;  %699 = vrsqrt.f32 %v1025_v55  ;;  %v147_v5 = vmul.f32 %v956_v61, %v146_v46  ;;  %636 = vmatmul.msk.f32.vlgmr.msra.gmra.mxu0 %vm67_vm0, %v308_v52  ;;  %v224_v15 = vmul.f32 %v1028_v29, %v223_v0 }
  0x99   :  { %v165_v7 = vmul.f32 0.5, %v164_v60  ;;  %v316_v56 = vsel %vm32_vm1, %v300_v62, %v760_v8  ;;  %v297_v8 = vmul.f32 %v191_v63, %v765_v9  ;;  %vm259_vm7 = vweird.f32 %v978_v27 }
  0x9a   :  { %v256_v6 = vsub.f32 1.5, %v255_v58  ;;  %v103_v11 = vpop.xlane.xlu1 %102  ;;  %v112_v12 = vpop.xlane.xlu2 %111  ;;  %644 = vmatmul.msk.f32.vlgmr.msra.gmra.mxu2 %vm67_vm0, %v316_v56  ;;  %v225_v26 = vmul.f32 0.5, %v224_v15  ;;  %vm169_vm9 = vweird.f32 %v1003_v44  ;;  %vm238_vm10 = vweird.f32 %v991_v39  ;;  %vm1110_vm14 = vmor %vm258_vm5, %vm259_vm7 }
  0x9b   :  { %v1047_v14 = vpop.eup %695  ;;  %v1059_v16 = vmax.f32 %v103_v11, 1e-24  ;;  %v1062_v17 = vmax.f32 %v112_v12, 1e-24  ;;  %v91_v18 = vpop.xlane.xlu0 %90  ;;  %v313_v28 = vsel %vm32_vm1, %v297_v8, %v765_v9  ;;  %v166_v34 = vsub.f32 1.5, %v165_v7 }
  0x9c   :  { %v233_v20 = vmul.f32 %v1047_v14, %v991_v39  ;;  %v1072_v21 = vpop.eup %697  ;;  %v257_v32 = vmul.f32 %v978_v27, %v256_v6  ;;  %641 = vmatmul.msk.f32.gmra.mxu1 %vm67_vm0, %v313_v28  ;;  %v226_v42 = vsub.f32 1.5, %v225_v26  ;;  %vm268_vm11 = vweird.f32 %v993_v40 }
  0x9d   :  { %701 = vrsqrt.f32 %v1059_v16  ;;  %v263_v41 = vmul.f32 %v1072_v21, %v993_v40  ;;  %v151_v22 = vsel %vm1083_vm8, %v956_v61, %v147_v5  ;;  %vm229_vm13 = vweird.f32 %v1028_v29  ;;  %vm1187_vm8 = vmor %vm168_vm12, %vm169_vm9 }
  0x9e   :  { %v234_v33 = vmul.f32 %v1047_v14, %v233_v20  ;;  %v1094_v9 = vpop.eup %699  ;;  %703 = vrsqrt.f32 %v1062_v17  ;;  %v227_v61 = vmul.f32 %v1028_v29, %v226_v42  ;;  %vm239_vm15 = vweird.f32 %v1047_v14  ;;  %vm1138_vm4 = vmor %vm228_vm6, %vm229_vm13 }
  0x9f   :  { %v264_v1 = vmul.f32 %v1072_v21, %v263_v41  ;;  %v193_v45 = vmul.f32 %v1094_v9, %v1025_v55  ;;  %vm198_vm2 = vweird.f32 %v1025_v55  ;;  %v293_v38 = vmul.f32 %v151_v22, %v770_v10  ;;  %vm1160_vm5 = vmor %vm238_vm10, %vm239_vm15 }
  0xa0   :  { %v235_v43 = vmul.f32 0.5, %v234_v33  ;;  %v1118_v50 = vmax.f32 %v91_v18, 1e-24  ;;  %v261_v53 = vsel %vm1110_vm14, %v978_v27, %v257_v32  ;;  %v1127_v60 = vmul.f32 %v1003_v44, %v166_v34 }
  0xa1   :  { %v265_v51 = vmul.f32 0.5, %v264_v1  ;;  %v194_v57 = vmul.f32 %v1094_v9, %v193_v45  ;;  %vm269_vm3 = vweird.f32 %v1072_v21  ;;  %v309_v62 = vsel %vm32_vm1, %v293_v38, %v770_v10 }
  0xa2   :  { %v236_v30 = vsub.f32 1.5, %v235_v43  ;;  %705 = vrsqrt.f32 %v1118_v50  ;;  %637 = vmatmul.msk.f32.gmra.mxu0 %vm67_vm0, %v309_v62  ;;  %v294_v10 = vmul.f32 %v161_v19, %v742_v2  ;;  %v231_v13 = vsel %vm1138_vm4, %v1028_v29, %v227_v61  ;;  %vm1174_vm7 = vmor %vm268_vm11, %vm269_vm3 }
  0xa3   :  { %v1124_v58 = vpop.eup %701  ;;  %v115_v63 = vpop.xlane.xlu0 %114  ;;  %v266_v0 = vsub.f32 1.5, %v265_v51  ;;  %v195_v52 = vmul.f32 0.5, %v194_v57  ;;  %v304_v56 = vmul.f32 %v261_v53, %v797_v23  ;;  %vm199_vm6 = vweird.f32 %v1094_v9 }
  0xa4   :  { %v243_v5 = vmul.f32 %v1124_v58, %v1059_v16  ;;  %v704_v6 = vpop.eup %703  ;;  %v237_v7 = vmul.f32 %v1047_v14, %v236_v30  ;;  %v1151_v11 = vmax.f32 %v115_v63, 1e-24  ;;  %v301_v29 = vmul.f32 %v231_v13, %v807_v25  ;;  %vm200_vm9 = vmor %vm198_vm2, %vm199_vm6 }
  0xa5   :  { %v267_v12 = vmul.f32 %v1072_v21, %v266_v0  ;;  %v196_v3 = vsub.f32 1.5, %v195_v52  ;;  %v273_v8 = vmul.f32 %v704_v6, %v1062_v17  ;;  %v320_v20 = vsel %vm32_vm1, %v304_v56, %v797_v23 }
  0xa6   :  { %v244_v15 = vmul.f32 %v1124_v58, %v243_v5  ;;  %707 = vrsqrt.f32 %v1151_v11  ;;  %v310_v31 = vsel %vm32_vm1, %v294_v10, %v742_v2  ;;  %648 = vmatmul.msk.f32.vlgmr.msra.gmra.mxu3 %vm67_vm0, %v320_v20  ;;  %vm249_vm10 = vweird.f32 %v1124_v58 }
  0xa7   :  { %v197_v19 = vmul.f32 %v1094_v9, %v196_v3  ;;  %v274_v28 = vmul.f32 %v704_v6, %v273_v8  ;;  %v317_v32 = vsel %vm32_vm1, %v301_v29, %v807_v25  ;;  %v241_v2 = vsel %vm1160_vm5, %v1047_v14, %v237_v7 }
  0xa8   :  { %v245_v26 = vmul.f32 0.5, %v244_v15  ;;  %v706_v23 = vpop.eup %705  ;;  %v271_v33 = vsel %vm1174_vm7, %v1072_v21, %v267_v12  ;;  %vm279_vm11 = vweird.f32 %v704_v6  ;;  %645 = vmatmul.msk.f32.gmra.mxu2 %vm67_vm0, %v317_v32  ;;  %v171_v25 = vsel %vm1187_vm8, %v1003_v44, %v1127_v60 }
  0xa9   :  { %v275_v41 = vmul.f32 0.5, %v274_v28  ;;  %v203_v34 = vmul.f32 %v706_v23, %v1118_v50  ;;  %v201_v14 = vsel %vm200_vm9, %v1094_v9, %v197_v19  ;;  %v302_v21 = vmul.f32 %v241_v2, %v827_v35 }
  0xaa   :  { %v246_v54 = vsub.f32 1.5, %v245_v26  ;;  %v305_v42 = vmul.f32 %v271_v33, %v832_v36  ;;  %638 = vmatmul.msk.f32.gmra.mxu0 %vm67_vm0, %v310_v31  ;;  %v298_v1 = vmul.f32 %v201_v14, %v837_v37  ;;  %vm248_vm12 = vweird.f32 %v1059_v16 }
  0xab   :  { %v276_v22 = vsub.f32 1.5, %v275_v41  ;;  %v204_v43 = vmul.f32 %v706_v23, %v203_v34  ;;  %vm1223_vm13 = vmor %vm248_vm12, %vm249_vm10  ;;  %vm278_vm14 = vweird.f32 %v1062_v17  ;;  %vm209_vm2 = vweird.f32 %v706_v23 }
  0xac   :  { %v247_v55 = vmul.f32 %v1124_v58, %v246_v54  ;;  %v708_v45 = vpop.eup %707  ;;  %v321_v44 = vsel %vm32_vm1, %v305_v42, %v832_v36  ;;  %vm280_vm15 = vmor %vm278_vm14, %vm279_vm11  ;;  %v295_v16 = vmul.f32 %v171_v25, %v802_v24  ;;  %v314_v36 = vsel %vm32_vm1, %v298_v1, %v837_v37 }
  0xad   :  { %v277_v46 = vmul.f32 %v704_v6, %v276_v22  ;;  %v205_v61 = vmul.f32 0.5, %v204_v43  ;;  %v283_v38 = vmul.f32 %v708_v45, %v1151_v11  ;;  %v318_v30 = vsel %vm32_vm1, %v302_v21, %v827_v35  ;;  %642 = vmatmul.msk.f32.gmra.mxu1 %vm67_vm0, %v314_v36 }
  0xae   :  { %649 = vmatmul.msk.f32.gmra.mxu3 %vm67_vm0, %v321_v44  ;;  %v251_v17 = vsel %vm1223_vm13, %v1124_v58, %v247_v55  ;;  %vm208_vm3 = vweird.f32 %v1118_v50  ;;  %v311_v35 = vsel %vm32_vm1, %v295_v16, %v802_v24  ;;  %vm289_vm5 = vweird.f32 %v708_v45 }
  0xaf   :  { %v206_v51 = vsub.f32 1.5, %v205_v61  ;;  %v284_v57 = vmul.f32 %v708_v45, %v283_v38  ;;  %v281_v53 = vsel %vm280_vm15, %v704_v6, %v277_v46  ;;  %vm210_vm4 = vmor %vm208_vm3, %vm209_vm2  ;;  %v303_v63 = vmul.f32 %v251_v17, %v857_v47 }
  0xb0   :  { %v306_v60 = vmul.f32 %v281_v53, %v862_v48  ;;  %646 = vmatmul.msk.f32.gmra.mxu2 %vm67_vm0, %v318_v30  ;;  %vm288_vm6 = vweird.f32 %v1151_v11 }
  0xb1   :  { %v207_v62 = vmul.f32 %v706_v23, %v206_v51  ;;  %v285_v37 = vmul.f32 0.5, %v284_v57  ;;  %vm290_vm7 = vmor %vm288_vm6, %vm289_vm5  ;;  %v319_v5 = vsel %vm32_vm1, %v303_v63, %v857_v47  ;;  %v1273_v47 = vld [vmem:[%s1484_s2] sm:$0x7]  ;;  %v713_v57 = vmov 128.0  }
  0xb2   :  { %639 = vmatmul.msk.f32.gmra.mxu0 %vm67_vm0, %v311_v35  ;;  %v322_v50 = vsel %vm32_vm1, %v306_v60, %v862_v48  ;;  %v333_v12 = vperm.slane %v1273_v47, 0  ;;  %709 = vrcp.f32 %v713_v57 }
  0xb3   :  { %v286_v27 = vsub.f32 1.5, %v285_v37  ;;  %v211_v58 = vsel %vm210_vm4, %v706_v23, %v207_v62 }
  0xb4   :  { %v299_v0 = vmul.f32 %v211_v58, %v867_v49 }
  0xb5   :  { %v287_v52 = vmul.f32 %v708_v45, %v286_v27 }
  0xb6   :  { %v315_v24 = vsel %vm32_vm1, %v299_v0, %v867_v49  ;;  %650 = vmatmul.msk.f32.gmra.mxu3 %vm67_vm0, %v322_v50 }
  0xb7   :  { %643 = vmatmul.msk.f32.gmra.mxu1 %vm67_vm0, %v315_v24  ;;  %v291_v10 = vsel %vm290_vm7, %v708_v45, %v287_v52 }
  0xb8   :  { %v307_v6 = vmul.f32 %v291_v10, %v887_v59  ;;  %647 = vmatmul.msk.f32.gmra.mxu2 %vm67_vm0, %v319_v5  ;;  %v710_v58 = vpop.eup %709 }
  0xb9   :  { %vm489_vm8 = vweird.f32 %v710_v58 }
  0xba   :  { %v323_v48 = vsel %vm32_vm1, %v307_v6, %v887_v59 }
  0xbe   :  { %651 = vmatmul.msk.f32.gmra.mxu3 %vm67_vm0, %v323_v48  ;;  %v485_v48 = vmul.f32 128.0, %v710_v58 }
 0x110   :  { %v411_v7 = vpop.f32.mrf.mxu1 }
 0x111   :  { %v1288_v23 = vadd.f32 %v411_v7, %v333_v12 }
 0x113   :  { %v454_v14 = vsel %vm67_vm0, %v1288_v23, 0.0 }
 0x115   :  { %v399_v49 = vpop.f32.mrf.mxu0 }
 0x116   :  { %v1278_v18 = vadd.f32 %v399_v49, %v333_v12 }
 0x118   :  { %v447_v19 = vsel %vm67_vm0, %v1278_v18, 0.0 }
 0x119   :  { %v414_v11 = vpop.f32.mrf.mxu1 }
 0x11a   :  { %v1292_v33 = vadd.f32 %v414_v11, %v333_v12  ;;  %v486_v11 = vsub.f32 1.0, %v485_v48 }
 0x11c   :  { %v456_v22 = vsel %vm67_vm0, %v1292_v33, 0.0 }
 0x11d   :  { %v423_v56 = vpop.f32.mrf.mxu2 }
 0x11e   :  { %v1304_v1 = vadd.f32 %v423_v56, %v333_v12 }
 0x11f   :  { %v402_v13 = vpop.f32.mrf.mxu0 }
 0x120   :  { %v1276_v15 = vadd.f32 %v402_v13, %v333_v12  ;;  %v462_v36 = vsel %vm67_vm0, %v1304_v1, 0.0 }
 0x122   :  { %v448_v39 = vsel %vm67_vm0, %v1276_v15, 0.0 }
 0x123   :  { %v449_v28 = vadd.f32 %v448_v39, %v447_v19 }
 0x127   :  { %v405_v3 = vpop.f32.mrf.mxu0 }
 0x128   :  { %v1280_v59 = vadd.f32 %v405_v3, %v333_v12 }
 0x129   :  { %v435_v8 = vpop.f32.mrf.mxu3 }
 0x12a   :  { %v417_v20 = vpop.f32.mrf.mxu1  ;;  %v450_v26 = vsel %vm67_vm0, %v1280_v59, 0.0  ;;  %v1320_v62 = vadd.f32 %v435_v8, %v333_v12 }
 0x12b   :  { %v426_v29 = vpop.f32.mrf.mxu2  ;;  %v451_v32 = vadd.f32 %v450_v26, %v449_v28  ;;  %v1298_v21 = vadd.f32 %v417_v20, %v333_v12 }
 0x12c   :  { %v1310_v61 = vadd.f32 %v426_v29, %v333_v12  ;;  %v470_v52 = vsel %vm67_vm0, %v1320_v62, 0.0  ;;  %v487_v29 = vmul.f32 %v710_v58, %v486_v11 }
 0x12d   :  { %v458_v45 = vsel %vm67_vm0, %v1298_v21, 0.0 }
 0x12e   :  { %v464_v17 = vsel %vm67_vm0, %v1310_v61, 0.0  ;;  %v488_v19 = vadd.f32 %v710_v58, %v487_v29 }
 0x12f   :  { %v408_v31 = vpop.f32.mrf.mxu0 }
 0x130   :  { %v1290_v40 = vadd.f32 %v408_v31, %v333_v12  ;;  %v1340_v28 = vsel %vm489_vm8, %v710_v58, %v488_v19 }
 0x131   :  { %v438_v2 = vpop.f32.mrf.mxu3 }
 0x132   :  { %v452_v54 = vsel %vm67_vm0, %v1290_v40, 0.0  ;;  %v1324_v63 = vadd.f32 %v438_v2, %v333_v12 }
 0x133   :  { %v453_v41 = vadd.f32 %v452_v54, %v451_v32  ;;  %v429_v34 = vpop.f32.mrf.mxu2 }
 0x134   :  { %v420_v25 = vpop.f32.mrf.mxu1  ;;  %v1314_v30 = vadd.f32 %v429_v34, %v333_v12  ;;  %v472_v10 = vsel %vm67_vm0, %v1324_v63, 0.0 }
 0x135   :  { %v1300_v42 = vadd.f32 %v420_v25, %v333_v12  ;;  %v455_v55 = vadd.f32 %v454_v14, %v453_v41 }
 0x136   :  { %v466_v37 = vsel %vm67_vm0, %v1314_v30, 0.0 }
 0x137   :  { %v457_v43 = vadd.f32 %v456_v22, %v455_v55  ;;  %v460_v44 = vsel %vm67_vm0, %v1300_v42, 0.0 }
 0x139   :  { %v459_v9 = vadd.f32 %v458_v45, %v457_v43  ;;  %v441_v46 = vpop.f32.mrf.mxu3 }
 0x13a   :  { %v1330_v24 = vadd.f32 %v441_v46, %v333_v12 }
 0x13b   :  { %v461_v38 = vadd.f32 %v460_v44, %v459_v9  ;;  %v432_v16 = vpop.f32.mrf.mxu2 }
 0x13c   :  { %v1318_v53 = vadd.f32 %v432_v16, %v333_v12  ;;  %v474_v7 = vsel %vm67_vm0, %v1330_v24, 0.0 }
 0x13d   :  { %v463_v51 = vadd.f32 %v462_v36, %v461_v38 }
 0x13e   :  { %v468_v27 = vsel %vm67_vm0, %v1318_v53, 0.0 }
 0x13f   :  { %v465_v60 = vadd.f32 %v464_v17, %v463_v51 }
 0x141   :  { %v467_v35 = vadd.f32 %v466_v37, %v465_v60  ;;  %v444_v50 = vpop.f32.mrf.mxu3 }
 0x142   :  { %v1334_v6 = vadd.f32 %v444_v50, %v333_v12 }
 0x143   :  { %v469_v0 = vadd.f32 %v468_v27, %v467_v35 }
 0x144   :  { %v476_v56 = vsel %vm67_vm0, %v1334_v6, 0.0 }
 0x145   :  { %v471_v5 = vadd.f32 %v470_v52, %v469_v0 }
 0x147   :  { %v473_v49 = vadd.f32 %v472_v10, %v471_v5 }
 0x149   :  { %v475_v13 = vadd.f32 %v474_v7, %v473_v49 }
 0x14b   :  { %v477_v3 = vadd.f32 %v476_v56, %v475_v13 }
 0x14d   :  { %v478_v8 = vrot.slane %v477_v3, 4 }
 0x14f   :  { %v479_v20 = vadd.f32 %v478_v8, %v477_v3 }
 0x151   :  { %v480_v39 = vrot.slane %v479_v20, 2 }
 0x153   :  { %v481_v26 = vadd.f32 %v480_v39, %v479_v20 }
 0x155   :  { %v482_v12 = vrot.slane %v481_v26, 1 }
 0x157   :  { %v483_v31 = vadd.f32 %v482_v12, %v481_v26 }
 0x159   :  { %v1343_v32 = vmul.f32 %v1340_v28, %v483_v31 }
 0x15b   :  { %v492_v2 = vsub.f32 %v1278_v18, %v1343_v32  ;;  %v493_v54 = vsub.f32 %v1276_v15, %v1343_v32  ;;  %v494_v41 = vsub.f32 %v1280_v59, %v1343_v32  ;;  %v495_v34 = vsub.f32 %v1290_v40, %v1343_v32 }
 0x15c   :  { %v496_v55 = vsub.f32 %v1288_v23, %v1343_v32  ;;  %v497_v43 = vsub.f32 %v1292_v33, %v1343_v32  ;;  %v498_v38 = vsub.f32 %v1298_v21, %v1343_v32  ;;  %v499_v57 = vsub.f32 %v1300_v42, %v1343_v32 }
 0x15d   :  { %v508_v25 = vmul.f32 %v492_v2, %v492_v2  ;;  %v509_v14 = vmul.f32 %v493_v54, %v493_v54  ;;  %v510_v22 = vmul.f32 %v494_v41, %v494_v41  ;;  %v511_v45 = vmul.f32 %v495_v34, %v495_v34 }
 0x15e   :  { %v512_v16 = vmul.f32 %v496_v55, %v496_v55  ;;  %v513_v17 = vmul.f32 %v497_v43, %v497_v43  ;;  %v500_v35 = vsub.f32 %v1304_v1, %v1343_v32  ;;  %v514_v27 = vmul.f32 %v498_v38, %v498_v38 }
 0x15f   :  { %v524_v44 = vsel %vm67_vm0, %v508_v25, 0.0  ;;  %v525_v9 = vsel %vm67_vm0, %v509_v14, 0.0  ;;  %v527_v36 = vsel %vm67_vm0, %v510_v22, 0.0  ;;  %v529_v60 = vsel %vm67_vm0, %v511_v45, 0.0 }
 0x160   :  { %v526_v46 = vadd.f32 %v525_v9, %v524_v44  ;;  %v531_v58 = vsel %vm67_vm0, %v512_v16, 0.0  ;;  %v501_v50 = vsub.f32 %v1310_v61, %v1343_v32  ;;  %v515_v52 = vmul.f32 %v499_v57, %v499_v57 }
 0x161   :  { %v533_v5 = vsel %vm67_vm0, %v513_v17, 0.0  ;;  %v502_v48 = vsub.f32 %v1314_v30, %v1343_v32  ;;  %v516_v49 = vmul.f32 %v500_v35, %v500_v35  ;;  %v535_v7 = vsel %vm67_vm0, %v514_v27, 0.0 }
 0x162   :  { %v528_v51 = vadd.f32 %v527_v36, %v526_v46  ;;  %v503_v56 = vsub.f32 %v1318_v53, %v1343_v32  ;;  %v517_v11 = vmul.f32 %v501_v50, %v501_v50  ;;  %v537_v3 = vsel %vm67_vm0, %v515_v52, 0.0 }
 0x163   :  { %v504_v29 = vsub.f32 %v1320_v62, %v1343_v32  ;;  %v518_v20 = vmul.f32 %v502_v48, %v502_v48  ;;  %v539_v39 = vsel %vm67_vm0, %v516_v49, 0.0  ;;  %v505_v26 = vsub.f32 %v1324_v63, %v1343_v32 }
 0x164   :  { %v530_v37 = vadd.f32 %v529_v60, %v528_v51  ;;  %v519_v12 = vmul.f32 %v503_v56, %v503_v56  ;;  %v541_v31 = vsel %vm67_vm0, %v517_v11, 0.0  ;;  %v506_v54 = vsub.f32 %v1330_v24, %v1343_v32 }
 0x165   :  { %v520_v41 = vmul.f32 %v504_v29, %v504_v29  ;;  %v543_v34 = vsel %vm67_vm0, %v518_v20, 0.0  ;;  %v507_v14 = vsub.f32 %v1334_v6, %v1343_v32  ;;  %v521_v55 = vmul.f32 %v505_v26, %v505_v26 }
 0x166   :  { %v532_v0 = vadd.f32 %v531_v58, %v530_v37  ;;  %v545_v22 = vsel %vm67_vm0, %v519_v12, 0.0  ;;  %v522_v45 = vmul.f32 %v506_v54, %v506_v54  ;;  %v575_v56 = vmul.f32 %v1343_v32, %v1273_v47 }
 0x167   :  { %v547_v44 = vsel %vm67_vm0, %v520_v41, 0.0  ;;  %v523_v46 = vmul.f32 %v507_v14, %v507_v14  ;;  %v549_v38 = vsel %vm67_vm0, %v521_v55, 0.0 }
 0x168   :  { %v534_v10 = vadd.f32 %v533_v5, %v532_v0  ;;  %v551_v36 = vsel %vm67_vm0, %v522_v45, 0.0 }
 0x169   :  { %v553_v57 = vsel %vm67_vm0, %v523_v46, 0.0 }
 0x16a   :  { %v536_v13 = vadd.f32 %v535_v7, %v534_v10 }
 0x16c   :  { %v538_v8 = vadd.f32 %v537_v3, %v536_v13 }
 0x16e   :  { %v540_v19 = vadd.f32 %v539_v39, %v538_v8 }
 0x170   :  { %v542_v2 = vadd.f32 %v541_v31, %v540_v19 }
 0x172   :  { %v544_v25 = vadd.f32 %v543_v34, %v542_v2 }
 0x174   :  { %v546_v43 = vadd.f32 %v545_v22, %v544_v25 }
 0x176   :  { %v548_v9 = vadd.f32 %v547_v44, %v546_v43 }
 0x178   :  { %v550_v16 = vadd.f32 %v549_v38, %v548_v9 }
 0x17a   :  { %v552_v51 = vadd.f32 %v551_v36, %v550_v16 }
 0x17c   :  { %v554_v17 = vadd.f32 %v553_v57, %v552_v51 }
 0x17e   :  { %v555_v60 = vrot.slane %v554_v17, 4 }
 0x180   :  { %v556_v37 = vadd.f32 %v555_v60, %v554_v17 }
 0x182   :  { %v557_v35 = vrot.slane %v556_v37, 2 }
 0x184   :  { %v558_v27 = vadd.f32 %v557_v35, %v556_v37 }
 0x186   :  { %v559_v58 = vrot.slane %v558_v27, 1 }
 0x188   :  { %v560_v0 = vadd.f32 %v559_v58, %v558_v27 }
 0x18a   :  { %v561_v50 = vmul.f32 %v560_v0, %v1340_v28 }
 0x18c   :  { %v562_v52 = vadd.f32 1e-05, %v561_v50 }
 0x18e   :  { %711 = vrsqrt.f32 %v562_v52  ;;  %vm569_vm9 = vweird.f32 %v562_v52 }
 0x194   :  { %v712_v5 = vpop.eup %711 }
 0x195   :  { %v564_v10 = vmul.f32 %v712_v5, %v562_v52  ;;  %vm570_vm10 = vweird.f32 %v712_v5 }
 0x196   :  { %vm571_vm11 = vmor %vm569_vm9, %vm570_vm10 }
 0x197   :  { %v565_v48 = vmul.f32 %v712_v5, %v564_v10 }
 0x199   :  { %v566_v49 = vmul.f32 0.5, %v565_v48 }
 0x19b   :  { %v567_v7 = vsub.f32 1.5, %v566_v49 }
 0x19d   :  { %v568_v13 = vmul.f32 %v712_v5, %v567_v7 }
 0x19f   :  { %v572_v11 = vsel %vm571_vm11, %v712_v5, %v568_v13 }
 0x1a0   :  { %v573_v3 = vmul.f32 %v572_v11, %v1273_v47  ;;  %v576_v8 = vmul.f32 %v575_v56, %v572_v11 }
 0x1a2   :  { %v574_v28 = vsel %vm32_vm1, %v573_v3, 1.0  ;;  %v578_v29 = vrot.slane %v576_v8, 7 }
 0x1a3   :  { %v582_v39 = vperm.slane %v574_v28, 1 }
 0x1a4   :  { %v580_v20 = vsub.f32 %v1273_v47, %v578_v29 }
 0x1a5   :  { %v583_v26 = vmul.f32 %v582_v39, %v1278_v18  ;;  %v584_v12 = vmul.f32 %v582_v39, %v1276_v15  ;;  %v585_v32 = vmul.f32 %v582_v39, %v1280_v59  ;;  %v586_v2 = vmul.f32 %v582_v39, %v1290_v40 }
 0x1a6   :  { %v581_v19 = vsel %vm32_vm1, %v580_v20, 0.0  ;;  %v587_v54 = vmul.f32 %v582_v39, %v1288_v23  ;;  %v588_v47 = vmul.f32 %v582_v39, %v1292_v33  ;;  %v589_v4 = vmul.f32 %v582_v39, %v1298_v21 }
 0x1a7   :  { %v599_v31 = vperm.slane %v581_v19, 2  ;;  %v590_v15 = vmul.f32 %v582_v39, %v1300_v42  ;;  %v591_v59 = vmul.f32 %v582_v39, %v1304_v1  ;;  %v592_v40 = vmul.f32 %v582_v39, %v1310_v61 }
 0x1a8   :  { %v593_v21 = vmul.f32 %v582_v39, %v1314_v30  ;;  %v594_v1 = vmul.f32 %v582_v39, %v1318_v53  ;;  %v595_v61 = vmul.f32 %v582_v39, %v1320_v62  ;;  %v596_v30 = vmul.f32 %v582_v39, %v1324_v63 }
 0x1a9   :  { %v600_v41 = vadd.f32 %v599_v31, %v583_v26  ;;  %v601_v34 = vadd.f32 %v599_v31, %v584_v12  ;;  %v602_v25 = vadd.f32 %v599_v31, %v585_v32  ;;  %v603_v14 = vadd.f32 %v599_v31, %v586_v2 }
 0x1aa   :  { %v604_v55 = vadd.f32 %v599_v31, %v587_v54  ;;  %v605_v18 = vadd.f32 %v599_v31, %v588_v47  ;;  %v606_v23 = vadd.f32 %v599_v31, %v589_v4  ;;  %v607_v33 = vadd.f32 %v599_v31, %v590_v15 }
 0x1ab   :  { %616 = vst.msk [vmem:[%s1485_s3] sm:$0xff] %vm67_vm0, %v600_v41  ;;  %v608_v42 = vadd.f32 %v599_v31, %v591_v59  ;;  %v609_v22 = vadd.f32 %v599_v31, %v592_v40  ;;  %v610_v43 = vadd.f32 %v599_v31, %v593_v21  ;;  %v611_v45 = vadd.f32 %v599_v31, %v594_v1 }
 0x1ac   :  { %617 = vst.msk [vmem:[%s1485_s3 + $0x8] sm:$0xff] %vm67_vm0, %v601_v34  ;;  %v597_v53 = vmul.f32 %v582_v39, %v1330_v24  ;;  %v612_v44 = vadd.f32 %v599_v31, %v595_v61  ;;  %v598_v62 = vmul.f32 %v582_v39, %v1334_v6  ;;  %v613_v9 = vadd.f32 %v599_v31, %v596_v30 }
 0x1ad   :  { %618 = vst.msk [vmem:[%s1485_s3 + $0x10] sm:$0xff] %vm67_vm0, %v602_v25 }
 0x1ae   :  { %619 = vst.msk [vmem:[%s1485_s3 + $0x18] sm:$0xff] %vm67_vm0, %v603_v14  ;;  %v614_v63 = vadd.f32 %v599_v31, %v597_v53  ;;  %v615_v24 = vadd.f32 %v599_v31, %v598_v62 }
 0x1af   :  { %620 = vst.msk [vmem:[%s1485_s3 + $0x20] sm:$0xff] %vm67_vm0, %v604_v55 }
 0x1b0   :  { %621 = vst.msk [vmem:[%s1485_s3 + $0x28] sm:$0xff] %vm67_vm0, %v605_v18 }
 0x1b1   :  { %622 = vst.msk [vmem:[%s1485_s3 + $0x30] sm:$0xff] %vm67_vm0, %v606_v23 }
 0x1b2   :  { %623 = vst.msk [vmem:[%s1485_s3 + $0x38] sm:$0xff] %vm67_vm0, %v607_v33 }
 0x1b3   :  { %624 = vst.msk [vmem:[%s1485_s3 + $0x40] sm:$0xff] %vm67_vm0, %v608_v42 }
 0x1b4   :  { %625 = vst.msk [vmem:[%s1485_s3 + $0x48] sm:$0xff] %vm67_vm0, %v609_v22 }
 0x1b5   :  { %626 = vst.msk [vmem:[%s1485_s3 + $0x50] sm:$0xff] %vm67_vm0, %v610_v43 }
 0x1b6   :  { %627 = vst.msk [vmem:[%s1485_s3 + $0x58] sm:$0xff] %vm67_vm0, %v611_v45 }
 0x1b7   :  { %628 = vst.msk [vmem:[%s1485_s3 + $0x60] sm:$0xff] %vm67_vm0, %v612_v44 }
 0x1b8   :  { %629 = vst.msk [vmem:[%s1485_s3 + $0x68] sm:$0xff] %vm67_vm0, %v613_v9 }
 0x1b9   :  { %630 = vst.msk [vmem:[%s1485_s3 + $0x70] sm:$0xff] %vm67_vm0, %v614_v63 }
 0x1ba   :  { %631 = vst.msk [vmem:[%s1485_s3 + $0x78] sm:$0xff] %vm67_vm0, %v615_v24 }

</bundles_post_ra>
